<compile_context>
chip_gen: v5e
topology: v5e:2x2
jax: 0.10.0
libtpu: 0.0.40
codegen_flags: <defaults>
</compile_context>

<pallas_src>
import jax
import jax.numpy as jnp
from jax.experimental import pallas as pl
from jax.experimental.pallas import tpu as pltpu

HIDDEN = 64            # per-head hidden width (actor 64 + critic 64 fused -> 128)
FUSED_H = 2 * HIDDEN   # 128
OUT_LANES = 128        # lane-dense output slab width


# ----------------------------- Pallas kernel ------------------------------- #
def _make_kernel(T, b_block, chunk_sizes):
    """Fused actor+critic MLP + T-axis log-softmax for one batch tile of b_block rows."""

    def kernel(emb_ref, w1_ref, b1_ref, w2_ref, b2_ref, ncrit_ref, out_ref):
        w1 = w1_ref[...]                           # (E, 128)
        b1 = b1_ref[...]                           # (1, 128)
        w2 = w2_ref[...]                           # (128, 128)
        b2 = b2_ref[...]                           # (1, 128)

        # ---- layers 1+2 per timestep; out_ref doubles as the raw-logits scratch ----
        for t in range(T):
            h = jnp.tanh(
                jnp.dot(emb_ref[t], w1, preferred_element_type=jnp.float32) + b1)
            out_ref[t] = jnp.dot(h, w2, preferred_element_type=jnp.float32) + b2

        # ---- log-softmax over the T axis (dim=1 of (B,T,A)), chunked over rows ----
        # ncrit is (1,128): 0.0 at the critic column (keeps raw value), 1.0 elsewhere.
        ncrit = ncrit_ref[...]
        c0 = 0
        for csz in chunk_sizes:
            rows = pl.ds(c0, csz)
            m = out_ref[0, rows, :]
            for t in range(1, T):
                m = jnp.maximum(m, out_ref[t, rows, :])
            se = jnp.exp(out_ref[0, rows, :] - m)
            for t in range(1, T):
                se = se + jnp.exp(out_ref[t, rows, :] - m)
            lse_masked = (m + jnp.log(se)) * ncrit           # one mask-mul per chunk
            for t in range(T):
                out_ref[t, rows, :] = out_ref[t, rows, :] - lse_masked
            c0 += csz

    return kernel


# ----------------------------- Helpers -------------------------------------- #
def _pick_b_block(B, T):
    """Batch tile: >=4 (preferably even) grid steps, ~1K rows per step, multiple of 8."""
    if B < 32:
        return B
    target_rows = 1024
    cands = [c for c in range(8, B, 8) if B % c == 0] + [B]
    best, best_score = B, None
    for cand in cands:
        nb = B // cand
        score = abs(cand * T - target_rows)
        if nb < 4:
            score += 1_000_000      # need enough steps to pipeline
        if nb % 2:
            score += 10_000         # even step count occupies both v7x TensorCores
        if best_score is None or score < best_score:
            best, best_score = cand, score
    return best


def _chunk_sizes(b_block, max_chunk=128):
    if b_block <= max_chunk:
        return (b_block,)
    n_full, rem = divmod(b_block, max_chunk)
    return tuple([max_chunk] * n_full + ([rem] if rem else []))


# ----------------------------- Wrapper -------------------------------------- #
def ac_theta_single_forward(params, SR, HDs, acts, values=None, *,
                            b_block=None, return_raw_slab=False):
    """Returns (log_softmax_logits (B, T, A), value (B,)).

    With return_raw_slab=True returns the kernel's (T, B, 128) slab directly (cols 0..A-1
    = log-probs, col A of the t=0 slab = critic value) so downstream consumers can avoid
    the post-kernel transpose/slice round trip through HBM.
    """
    w1a, b1a, w2a, b2a, w1c, b1c, w2c, b2c = params
    B, T, S = SR.shape
    A = w2a.shape[1]
    assert w1a.shape[0] == S + 3
    assert A + 1 <= OUT_LANES

    if b_block is None:
        b_block = _pick_b_block(B, T)
    assert B % b_block == 0 and (b_block == B or b_block % 8 == 0), \
        "b_block must divide B and be a multiple of 8 (or equal B)"
    nb = B // b_block
    f32 = jnp.float32

    # ---- single contiguous t-major embedding (T, B, E); skip the zero values column ----
    has_values = values is not None
    E = S + 3 if has_values else S + 2
    cols = [jnp.moveaxis(SR, 0, 1).astype(f32),        # (T, B, S)
            HDs.T[..., None].astype(f32),              # (T, B, 1)
            acts.T[..., None].astype(f32)]             # (T, B, 1)
    if has_values:
        cols.append(values.T[..., None].astype(f32))   # (T, B, 1)
    emb = jnp.concatenate(cols, axis=-1)               # (T, B, E)

    # ---- fuse actor + critic weights (tiny arrays, folded into the jit) ----
    w1f = jnp.concatenate([w1a, w1c], axis=1).astype(f32)[:E]           # (E, 128)
    b1f = jnp.concatenate([b1a, b1c], axis=1).astype(f32)               # (1, 128)
    w2f = jnp.zeros((FUSED_H, OUT_LANES), f32)
    w2f = w2f.at[:HIDDEN, :A].set(w2a.astype(f32))
    w2f = w2f.at[HIDDEN:, A:A + 1].set(w2c.astype(f32))
    b2f = jnp.zeros((1, OUT_LANES), f32)
    b2f = b2f.at[:, :A].set(b2a.astype(f32))
    b2f = b2f.at[:, A:A + 1].set(b2c.astype(f32))
    # lane mask: 0.0 at the critic column (keep raw), 1.0 elsewhere (apply log-softmax)
    ncrit = (jnp.arange(OUT_LANES) != A).astype(f32)[None, :]            # (1, 128)

    tile3 = lambda i: (0, i, 0)
    full2 = lambda i: (0, 0)
    in_specs = [
        pl.BlockSpec((T, b_block, E), tile3),
        pl.BlockSpec((E, FUSED_H), full2),
        pl.BlockSpec((1, FUSED_H), full2),
        pl.BlockSpec((FUSED_H, OUT_LANES), full2),
        pl.BlockSpec((1, OUT_LANES), full2),
        pl.BlockSpec((1, OUT_LANES), full2),
    ]

    kernel = _make_kernel(T, b_block, _chunk_sizes(b_block))
    out = pl.pallas_call(
        kernel,
        grid=(nb,),
        in_specs=in_specs,
        out_specs=pl.BlockSpec((T, b_block, OUT_LANES), tile3),
        out_shape=jax.ShapeDtypeStruct((T, B, OUT_LANES), f32),
        compiler_params=pltpu.CompilerParams(
            dimension_semantics=("parallel",)),   # batch tiles are independent
    )(emb, w1f, b1f, w2f, b2f, ncrit)

    if return_raw_slab:
        # NOTE: lanes A+1..127 of the slab are padding (hold -log(T)); never read them.
        return out, A

    logp = jnp.moveaxis(out[:, :, :A], 0, 1)        # (B, T, A)
    value = out[0, :, A]                            # (B,) == critic(embedding)[:, 0, :].squeeze(1)
    # TODO(synk): torch returns a torch.distributions.Categorical over these logits;
    # we return the log-prob logits (log_softmax over dim=1) themselves.
    return logp, value


# ----------------------------- Parameter init ------------------------------- #
def _init_linear(key, in_dim, out_dim):
    # matches init_params: weight ~ N(0,1), row-L2-normalized; bias = 0
    w = jax.random.normal(key, (out_dim, in_dim), jnp.float32)
    w = w / jnp.sqrt(jnp.sum(w * w, axis=1, keepdims=True))
    b = jnp.zeros((out_dim,), jnp.float32)
    return w.T, b[None, :]          # W transposed -> (in, out); bias -> (1, out)


def make_params(key, embedding_size, act_dim):
    k1, k2, k3, k4 = jax.random.split(key, 4)
    w1a, b1a = _init_linear(k1, embedding_size, HIDDEN)
    w2a, b2a = _init_linear(k2, HIDDEN, act_dim)
    w1c, b1c = _init_linear(k3, embedding_size, HIDDEN)
    w2c, b2c = _init_linear(k4, HIDDEN, 1)
    return (w1a, b1a, w2a, b2a, w1c, b1c, w2c, b2c)


# ----------------------------- Pure-JAX reference --------------------------- #
def _ref_forward(params, SR, HDs, acts, values=None):
    if values is None:
        values = jnp.zeros(HDs.shape, HDs.dtype)
    emb = jnp.concatenate(
        [SR, HDs[:, :, None], acts[:, :, None], values[:, :, None]], axis=-1
    ).astype(jnp.float32)
    w1a, b1a, w2a, b2a, w1c, b1c, w2c, b2c = params
    h = jnp.tanh(emb @ w1a + b1a)
    logits = h @ w2a + b2a
    logp = jax.nn.log_softmax(logits, axis=1)
    hc = jnp.tanh(emb @ w1c + b1c)
    crit = hc @ w2c + b2c
    return logp, crit[:, 0, 0]


# ----------------------------- Demo ----------------------------------------- #
def _check(params, SR, HDs, acts, values, A):
    logp, value = jax.jit(ac_theta_single_forward)(params, SR, HDs, acts, values)
    jax.block_until_ready((logp, value))
    ref_logp, ref_value = _ref_forward(params, SR, HDs, acts, values)
    assert logp.shape == ref_logp.shape and value.shape == ref_value.shape
    assert jnp.allclose(logp, ref_logp, atol=5e-5, rtol=5e-5), \
        float(jnp.max(jnp.abs(logp - ref_logp)))
    assert jnp.allclose(value, ref_value, atol=5e-5, rtol=5e-5), \
        float(jnp.max(jnp.abs(value - ref_value)))


if __name__ == "__main__":
    key = jax.random.PRNGKey(0)

    # --- case 1: module defaults (k=1 -> T=2), values=None, tiny batch ---
    B, T, SR_single, act_dim = 2, 2, 8, 7
    E = SR_single + 3
    kp, ks, kh, ka, key = jax.random.split(key, 5)
    params = make_params(kp, E, act_dim)
    SR = jax.random.normal(ks, (B, T, SR_single), jnp.float32)
    HDs = jax.random.uniform(kh, (B, T), jnp.float32, 0.0, 4.0)
    acts = jax.random.uniform(ka, (B, T), jnp.float32, 0.0, float(act_dim))
    _check(params, SR, HDs, acts, None, act_dim)

    # --- case 2: larger batch (multi-step grid), values provided ---
    B2, T2, SR2, act2 = 64, 4, 13, 5
    E2 = SR2 + 3
    kp, ks, kh, ka, kv = jax.random.split(key, 5)
    params2 = make_params(kp, E2, act2)
    SR_b = jax.random.normal(ks, (B2, T2, SR2), jnp.float32)
    HDs_b = jax.random.uniform(kh, (B2, T2), jnp.float32, 0.0, 4.0)
    acts_b = jax.random.uniform(ka, (B2, T2), jnp.float32, 0.0, float(act2))
    vals_b = jax.random.normal(kv, (B2, T2), jnp.float32)
    _check(params2, SR_b, HDs_b, acts_b, vals_b, act2)

    print("KERNEL_OK")
</pallas_src>

<mosaic_0001>
module attributes {stable_mosaic.version = 11 : i64} {
  func.func @kernel(%arg0: i32, %arg1: memref<2x2x10xf32, #tpu.memory_space<vmem>>, %arg2: memref<10x128xf32, #tpu.memory_space<vmem>>, %arg3: memref<1x128xf32, #tpu.memory_space<vmem>>, %arg4: memref<128x128xf32, #tpu.memory_space<vmem>>, %arg5: memref<1x128xf32, #tpu.memory_space<vmem>>, %arg6: memref<1x128xf32, #tpu.memory_space<vmem>>, %arg7: memref<2x2x128xf32, #tpu.memory_space<vmem>>) attributes {dimension_semantics = [#tpu.dimension_semantics<parallel>], iteration_bounds = array<i64: 1>, scalar_prefetch = 0 : i64, scratch_operands = 0 : i64, tpu.core_type = #tpu.core_type<tc>, window_params = [{transform_indices = @transform_0, window_bounds = array<i64: 2, 2, 10>}, {pipeline_mode = #tpu.pipeline_mode<synchronous>, transform_indices = @transform_1, window_bounds = array<i64: 10, 128>}, {pipeline_mode = #tpu.pipeline_mode<synchronous>, transform_indices = @transform_2, window_bounds = array<i64: 1, 128>}, {pipeline_mode = #tpu.pipeline_mode<synchronous>, transform_indices = @transform_3, window_bounds = array<i64: 128, 128>}, {pipeline_mode = #tpu.pipeline_mode<synchronous>, transform_indices = @transform_4, window_bounds = array<i64: 1, 128>}, {pipeline_mode = #tpu.pipeline_mode<synchronous>, transform_indices = @transform_5, window_bounds = array<i64: 1, 128>}, {transform_indices = @transform_6, window_bounds = array<i64: 2, 2, 128>}]} {
    %c0 = arith.constant 0 : index
    %c0_0 = arith.constant 0 : index
    %0 = vector.load %arg2[%c0, %c0_0] : memref<10x128xf32, #tpu.memory_space<vmem>>, vector<10x128xf32>
    %c0_1 = arith.constant 0 : index
    %c0_2 = arith.constant 0 : index
    %1 = vector.load %arg3[%c0_1, %c0_2] : memref<1x128xf32, #tpu.memory_space<vmem>>, vector<1x128xf32>
    %c0_3 = arith.constant 0 : index
    %c0_4 = arith.constant 0 : index
    %2 = vector.load %arg4[%c0_3, %c0_4] : memref<128x128xf32, #tpu.memory_space<vmem>>, vector<128x128xf32>
    %c0_5 = arith.constant 0 : index
    %c0_6 = arith.constant 0 : index
    %3 = vector.load %arg5[%c0_5, %c0_6] : memref<1x128xf32, #tpu.memory_space<vmem>>, vector<1x128xf32>
    %c0_7 = arith.constant 0 : index
    %c0_8 = arith.constant 0 : index
    %c0_9 = arith.constant 0 : index
    %4 = vector.load %arg1[%c0_7, %c0_8, %c0_9] : memref<2x2x10xf32, #tpu.memory_space<vmem>>, vector<1x2x10xf32>
    %5 = vector.shape_cast %4 : vector<1x2x10xf32> to vector<2x10xf32>
    %cst = arith.constant dense<0.000000e+00> : vector<2x128xf32>
    %6 = tpu.matmul %5, %0, %cst {dimension_numbers = #tpu.dot_dimension_numbers<[1], [0], [0], [1], [0, 0, 1, 1], [], []>} : vector<2x10xf32>, vector<10x128xf32>, vector<2x128xf32> -> vector<2x128xf32>
    %7 = vector.broadcast %1 : vector<1x128xf32> to vector<2x128xf32>
    %8 = arith.addf %6, %7 : vector<2x128xf32>
    %9 = math.tanh %8 : vector<2x128xf32>
    %cst_10 = arith.constant dense<0.000000e+00> : vector<2x128xf32>
    %10 = tpu.matmul %9, %2, %cst_10 {dimension_numbers = #tpu.dot_dimension_numbers<[1], [0], [0], [1], [0, 0, 1, 1], [], []>} : vector<2x128xf32>, vector<128x128xf32>, vector<2x128xf32> -> vector<2x128xf32>
    %11 = vector.broadcast %3 : vector<1x128xf32> to vector<2x128xf32>
    %12 = arith.addf %10, %11 : vector<2x128xf32>
    %c0_11 = arith.constant 0 : index
    %c0_12 = arith.constant 0 : index
    %c0_13 = arith.constant 0 : index
    %13 = vector.load %arg7[%c0_11, %c0_12, %c0_13] : memref<2x2x128xf32, #tpu.memory_space<vmem>>, vector<1x2x128xf32>
    %14 = vector.shape_cast %13 : vector<1x2x128xf32> to vector<2x128xf32>
    %15 = vector.shape_cast %12 : vector<2x128xf32> to vector<1x2x128xf32>
    tpu.vector_store %arg7[%c0_11, %c0_12, %c0_13], %15 {strides = array<i32>} : memref<2x2x128xf32, #tpu.memory_space<vmem>>, vector<1x2x128xf32>,
    %c1 = arith.constant 1 : index
    %c0_14 = arith.constant 0 : index
    %c0_15 = arith.constant 0 : index
    %16 = vector.load %arg1[%c1, %c0_14, %c0_15] : memref<2x2x10xf32, #tpu.memory_space<vmem>>, vector<1x2x10xf32>
    %17 = vector.shape_cast %16 : vector<1x2x10xf32> to vector<2x10xf32>
    %cst_16 = arith.constant dense<0.000000e+00> : vector<2x128xf32>
    %18 = tpu.matmul %17, %0, %cst_16 {dimension_numbers = #tpu.dot_dimension_numbers<[1], [0], [0], [1], [0, 0, 1, 1], [], []>} : vector<2x10xf32>, vector<10x128xf32>, vector<2x128xf32> -> vector<2x128xf32>
    %19 = vector.broadcast %1 : vector<1x128xf32> to vector<2x128xf32>
    %20 = arith.addf %18, %19 : vector<2x128xf32>
    %21 = math.tanh %20 : vector<2x128xf32>
    %cst_17 = arith.constant dense<0.000000e+00> : vector<2x128xf32>
    %22 = tpu.matmul %21, %2, %cst_17 {dimension_numbers = #tpu.dot_dimension_numbers<[1], [0], [0], [1], [0, 0, 1, 1], [], []>} : vector<2x128xf32>, vector<128x128xf32>, vector<2x128xf32> -> vector<2x128xf32>
    %23 = vector.broadcast %3 : vector<1x128xf32> to vector<2x128xf32>
    %24 = arith.addf %22, %23 : vector<2x128xf32>
    %c1_18 = arith.constant 1 : index
    %c0_19 = arith.constant 0 : index
    %c0_20 = arith.constant 0 : index
    %25 = vector.load %arg7[%c1_18, %c0_19, %c0_20] : memref<2x2x128xf32, #tpu.memory_space<vmem>>, vector<1x2x128xf32>
    %26 = vector.shape_cast %25 : vector<1x2x128xf32> to vector<2x128xf32>
    %27 = vector.shape_cast %24 : vector<2x128xf32> to vector<1x2x128xf32>
    tpu.vector_store %arg7[%c1_18, %c0_19, %c0_20], %27 {strides = array<i32>} : memref<2x2x128xf32, #tpu.memory_space<vmem>>, vector<1x2x128xf32>,
    %c0_21 = arith.constant 0 : index
    %c0_22 = arith.constant 0 : index
    %28 = vector.load %arg6[%c0_21, %c0_22] : memref<1x128xf32, #tpu.memory_space<vmem>>, vector<1x128xf32>
    %c0_23 = arith.constant 0 : index
    %c0_24 = arith.constant 0 : index
    %c0_25 = arith.constant 0 : index
    %29 = vector.load %arg7[%c0_23, %c0_24, %c0_25] : memref<2x2x128xf32, #tpu.memory_space<vmem>>, vector<1x2x128xf32>
    %30 = vector.shape_cast %29 : vector<1x2x128xf32> to vector<2x128xf32>
    %c1_26 = arith.constant 1 : index
    %c0_27 = arith.constant 0 : index
    %c0_28 = arith.constant 0 : index
    %31 = vector.load %arg7[%c1_26, %c0_27, %c0_28] : memref<2x2x128xf32, #tpu.memory_space<vmem>>, vector<1x2x128xf32>
    %32 = vector.shape_cast %31 : vector<1x2x128xf32> to vector<2x128xf32>
    %33 = arith.maximumf %30, %32 : vector<2x128xf32>
    %c0_29 = arith.constant 0 : index
    %c0_30 = arith.constant 0 : index
    %c0_31 = arith.constant 0 : index
    %34 = vector.load %arg7[%c0_29, %c0_30, %c0_31] : memref<2x2x128xf32, #tpu.memory_space<vmem>>, vector<1x2x128xf32>
    %35 = vector.shape_cast %34 : vector<1x2x128xf32> to vector<2x128xf32>
    %36 = arith.subf %35, %33 : vector<2x128xf32>
    %37 = math.exp %36 : vector<2x128xf32>
    %c1_32 = arith.constant 1 : index
    %c0_33 = arith.constant 0 : index
    %c0_34 = arith.constant 0 : index
    %38 = vector.load %arg7[%c1_32, %c0_33, %c0_34] : memref<2x2x128xf32, #tpu.memory_space<vmem>>, vector<1x2x128xf32>
    %39 = vector.shape_cast %38 : vector<1x2x128xf32> to vector<2x128xf32>
    %40 = arith.subf %39, %33 : vector<2x128xf32>
    %41 = math.exp %40 : vector<2x128xf32>
    %42 = arith.addf %37, %41 : vector<2x128xf32>
    %43 = math.log %42 : vector<2x128xf32>
    %44 = arith.addf %33, %43 : vector<2x128xf32>
    %45 = vector.broadcast %28 : vector<1x128xf32> to vector<2x128xf32>
    %46 = arith.mulf %44, %45 : vector<2x128xf32>
    %c0_35 = arith.constant 0 : index
    %c0_36 = arith.constant 0 : index
    %c0_37 = arith.constant 0 : index
    %47 = vector.load %arg7[%c0_35, %c0_36, %c0_37] : memref<2x2x128xf32, #tpu.memory_space<vmem>>, vector<1x2x128xf32>
    %48 = vector.shape_cast %47 : vector<1x2x128xf32> to vector<2x128xf32>
    %49 = arith.subf %48, %46 : vector<2x128xf32>
    %c0_38 = arith.constant 0 : index
    %c0_39 = arith.constant 0 : index
    %c0_40 = arith.constant 0 : index
    %50 = vector.load %arg7[%c0_38, %c0_39, %c0_40] : memref<2x2x128xf32, #tpu.memory_space<vmem>>, vector<1x2x128xf32>
    %51 = vector.shape_cast %50 : vector<1x2x128xf32> to vector<2x128xf32>
    %52 = vector.shape_cast %49 : vector<2x128xf32> to vector<1x2x128xf32>
    tpu.vector_store %arg7[%c0_38, %c0_39, %c0_40], %52 {strides = array<i32>} : memref<2x2x128xf32, #tpu.memory_space<vmem>>, vector<1x2x128xf32>,
    %c1_41 = arith.constant 1 : index
    %c0_42 = arith.constant 0 : index
    %c0_43 = arith.constant 0 : index
    %53 = vector.load %arg7[%c1_41, %c0_42, %c0_43] : memref<2x2x128xf32, #tpu.memory_space<vmem>>, vector<1x2x128xf32>
    %54 = vector.shape_cast %53 : vector<1x2x128xf32> to vector<2x128xf32>
    %55 = arith.subf %54, %46 : vector<2x128xf32>
    %c1_44 = arith.constant 1 : index
    %c0_45 = arith.constant 0 : index
    %c0_46 = arith.constant 0 : index
    %56 = vector.load %arg7[%c1_44, %c0_45, %c0_46] : memref<2x2x128xf32, #tpu.memory_space<vmem>>, vector<1x2x128xf32>
    %57 = vector.shape_cast %56 : vector<1x2x128xf32> to vector<2x128xf32>
    %58 = vector.shape_cast %55 : vector<2x128xf32> to vector<1x2x128xf32>
    tpu.vector_store %arg7[%c1_44, %c0_45, %c0_46], %58 {strides = array<i32>} : memref<2x2x128xf32, #tpu.memory_space<vmem>>, vector<1x2x128xf32>,
    return
  }
  func.func @transform_0(%arg0: i32) -> (i32, i32, i32) {
    %c0_i32 = arith.constant 0 : i32
    %c0_i32_0 = arith.constant 0 : i32
    %c0_i32_1 = arith.constant 0 : i32
    return %c0_i32, %arg0, %c0_i32_0 : i32, i32, i32
  }
  func.func @transform_1(%arg0: i32) -> (i32, i32) {
    %c0_i32 = arith.constant 0 : i32
    %c0_i32_0 = arith.constant 0 : i32
    %c0_i32_1 = arith.constant 0 : i32
    return %c0_i32, %c0_i32_0 : i32, i32
  }
  func.func @transform_2(%arg0: i32) -> (i32, i32) {
    %c0_i32 = arith.constant 0 : i32
    %c0_i32_0 = arith.constant 0 : i32
    %c0_i32_1 = arith.constant 0 : i32
    return %c0_i32, %c0_i32_0 : i32, i32
  }
  func.func @transform_3(%arg0: i32) -> (i32, i32) {
    %c0_i32 = arith.constant 0 : i32
    %c0_i32_0 = arith.constant 0 : i32
    %c0_i32_1 = arith.constant 0 : i32
    return %c0_i32, %c0_i32_0 : i32, i32
  }
  func.func @transform_4(%arg0: i32) -> (i32, i32) {
    %c0_i32 = arith.constant 0 : i32
    %c0_i32_0 = arith.constant 0 : i32
    %c0_i32_1 = arith.constant 0 : i32
    return %c0_i32, %c0_i32_0 : i32, i32
  }
  func.func @transform_5(%arg0: i32) -> (i32, i32) {
    %c0_i32 = arith.constant 0 : i32
    %c0_i32_0 = arith.constant 0 : i32
    %c0_i32_1 = arith.constant 0 : i32
    return %c0_i32, %c0_i32_0 : i32, i32
  }
  func.func @transform_6(%arg0: i32) -> (i32, i32, i32) {
    %c0_i32 = arith.constant 0 : i32
    %c0_i32_0 = arith.constant 0 : i32
    %c0_i32_1 = arith.constant 0 : i32
    return %c0_i32, %arg0, %c0_i32_0 : i32, i32, i32
  }
}

</mosaic_0001>

<bundles_post_ra>
// kernel: ac_theta_single_forward.1
= control target key start
LH: loop header
LB: loop body
LE: loop exit
PB: predicated region body
PF: predicated region fallthrough
CT: control target
= control target key end

     0   :  { %vm51_vm0 = vcmask 1041408   ;;  %vm47_vm1 = vcmask 80896   ;;  %s322_s1 = inlined_call_operand.vmem [shape: f32[10,128], index: 1, kind: input, shape index: {}]   ;;  %s323_s0 = inlined_call_operand.vmem [shape: f32[2,2,10], index: 0, kind: input, shape index: {}]   ;;  %s324_s3 = inlined_call_operand.vmem [shape: f32[128,128], index: 3, kind: input, shape index: {}]   ;;  %s325_s2 = inlined_call_operand.vmem [shape: f32[1,128], index: 2, kind: input, shape index: {}]   ;;  %s326_s4 = inlined_call_operand.vmem [shape: f32[1,128], index: 4, kind: input, shape index: {}]   ;;  %s327_s5 = inlined_call_operand.vmem [shape: f32[1,128], index: 5, kind: input, shape index: {}]   ;;  %s328_s6 = inlined_call_operand.vmem [shape: f32[2,2,128], index: 6, kind: output, shape index: {}]  }
   0x1   :  { %v24_v0 = vld [vmem:[%s322_s1 + $0x8] sm:$0x3]  ;;  %v23_v1 = vld [vmem:[%s322_s1] sm:$0xff]  ;;  %v41_v4 = vld [vmem:[%s324_s3 + $0x78] sm:$0xff] }
   0x2   :  { %178 = vmatpush.msk.msra.mxu2 %vm51_vm0, %v24_v0  ;;  %v177_v2 = vld [vmem:[%s323_s0 + $0x2] sm:$0x3]  ;;  %175 = vmatpush.msk.msra.mxu0 %vm51_vm0, %v24_v0  ;;  %v43_v3 = vld [vmem:[%s323_s0] sm:$0x3]  ;;  %v40_v5 = vld [vmem:[%s324_s3 + $0x70] sm:$0xff] }
   0x3   :  { %126 = vmatpush.msra.mxu3 %v41_v4  ;;  %79 = vmatpush.msra.mxu1 %v41_v4  ;;  %v39_v6 = vld [vmem:[%s324_s3 + $0x68] sm:$0xff]  ;;  %v38_v7 = vld [vmem:[%s324_s3 + $0x60] sm:$0xff]  ;;  %v37_v8 = vld [vmem:[%s324_s3 + $0x58] sm:$0xff] }
   0x4   :  { %120 = vmatpush.msra.mxu2 %v23_v1  ;;  %70 = vmatpush.msra.mxu0 %v23_v1  ;;  %v36_v9 = vld [vmem:[%s324_s3 + $0x50] sm:$0xff]  ;;  %v35_v10 = vld [vmem:[%s324_s3 + $0x48] sm:$0xff]  ;;  %v34_v11 = vld [vmem:[%s324_s3 + $0x40] sm:$0xff] }
   0x5   :  { %179 = vmatmul.msk.f32.vlgmr.msra.gmra.mxu2 %vm47_vm1, %v177_v2  ;;  %176 = vmatmul.msk.f32.vlgmr.msra.gmra.mxu0 %vm47_vm1, %v43_v3  ;;  %v33_v12 = vld [vmem:[%s324_s3 + $0x38] sm:$0xff]  ;;  %v32_v13 = vld [vmem:[%s324_s3 + $0x30] sm:$0xff]  ;;  %v31_v14 = vld [vmem:[%s324_s3 + $0x28] sm:$0xff] }
   0x6   :  { %127 = vmatpush.msra.mxu3 %v40_v5  ;;  %80 = vmatpush.msra.mxu1 %v40_v5  ;;  %v30_v15 = vld [vmem:[%s324_s3 + $0x20] sm:$0xff]  ;;  %v29_v16 = vld [vmem:[%s324_s3 + $0x18] sm:$0xff]  ;;  %v28_v17 = vld [vmem:[%s324_s3 + $0x10] sm:$0xff] }
   0x7   :  { %v27_v18 = vld [vmem:[%s324_s3 + $0x8] sm:$0xff]  ;;  %v26_v19 = vld [vmem:[%s324_s3] sm:$0xff] }
   0x8   :  { %128 = vmatpush.msra.mxu3 %v39_v6  ;;  %81 = vmatpush.msra.mxu1 %v39_v6  ;;  %v184_v20 = vld [vmem:[%s325_s2] ss:$0 sm:$0xff] }
   0x9   :  { %v185_v27 = vld [vmem:[%s326_s4] ss:$0 sm:$0xff] }
   0xa   :  { %129 = vmatpush.msra.mxu3 %v38_v7  ;;  %82 = vmatpush.msra.mxu1 %v38_v7  ;;  %v186_v44 = vld [vmem:[%s327_s5] ss:$0 sm:$0xff] }
   0xc   :  { %130 = vmatpush.msra.mxu3 %v37_v8  ;;  %83 = vmatpush.msra.mxu1 %v37_v8 }
   0xe   :  { %131 = vmatpush.msra.mxu3 %v36_v9  ;;  %84 = vmatpush.msra.mxu1 %v36_v9 }
  0x10   :  { %132 = vmatpush.msra.mxu3 %v35_v10  ;;  %85 = vmatpush.msra.mxu1 %v35_v10 }
  0x12   :  { %133 = vmatpush.msra.mxu3 %v34_v11  ;;  %86 = vmatpush.msra.mxu1 %v34_v11 }
  0x14   :  { %134 = vmatpush.msra.mxu3 %v33_v12  ;;  %87 = vmatpush.msra.mxu1 %v33_v12 }
  0x16   :  { %135 = vmatpush.msra.mxu3 %v32_v13  ;;  %88 = vmatpush.msra.mxu1 %v32_v13 }
  0x18   :  { %136 = vmatpush.msra.mxu3 %v31_v14  ;;  %89 = vmatpush.msra.mxu1 %v31_v14 }
  0x1a   :  { %137 = vmatpush.msra.mxu3 %v30_v15  ;;  %90 = vmatpush.msra.mxu1 %v30_v15 }
  0x1c   :  { %138 = vmatpush.msra.mxu3 %v29_v16  ;;  %91 = vmatpush.msra.mxu1 %v29_v16 }
  0x1e   :  { %139 = vmatpush.msra.mxu3 %v28_v17  ;;  %92 = vmatpush.msra.mxu1 %v28_v17 }
  0x20   :  { %140 = vmatpush.msra.mxu3 %v27_v18  ;;  %93 = vmatpush.msra.mxu1 %v27_v18 }
  0x22   :  { %141 = vmatpush.msra.mxu3 %v26_v19  ;;  %94 = vmatpush.msra.mxu1 %v26_v19 }
  0x82   :  { %v72_v21 = vpop.f32.mrf.mxu0 }
  0x83   :  { %v73_v22 = vadd.f32 %v184_v20, %v72_v21 }
  0x85   :  { %187 = vtanh.f32 %v73_v22 }
  0x88   :  { %v122_v23 = vpop.f32.mrf.mxu2 }
  0x89   :  { %v123_v24 = vadd.f32 %v184_v20, %v122_v23 }
  0x8b   :  { %v188_v25 = vpop.eup %187  ;;  %189 = vtanh.f32 %v123_v24 }
  0x8c   :  { %95 = vmatmul.f32.vlgmr.msra.gmra.mxu1 %v188_v25 }
  0x91   :  { %v190_v26 = vpop.eup %189 }
  0x92   :  { %142 = vmatmul.f32.vlgmr.msra.gmra.mxu3 %v190_v26 }
 0x109   :  { %v96_v28 = vpop.f32.mrf.mxu1 }
 0x10a   :  { %v97_v29 = vadd.f32 %v185_v27, %v96_v28 }
 0x10c   :  { %99 = vst [vmem:[%s328_s6] sm:$0x3] %v97_v29 }
 0x113   :  { %v149_v32 = vld [vmem:[%s328_s6] sm:$0x3] }
 0x115   :  { %v143_v30 = vpop.f32.mrf.mxu3 }
 0x116   :  { %v144_v31 = vadd.f32 %v185_v27, %v143_v30 }
 0x118   :  { %180 = vst [vmem:[%s328_s6 + $0x2] sm:$0x3] %v144_v31 }
 0x11f   :  { %v181_v33 = vld [vmem:[%s328_s6 + $0x2] sm:$0x3] }
 0x120   :  { %v151_v34 = vmax.f32 %v149_v32, %v181_v33  ;;  %v182_v47 = vld [vmem:[%s328_s6 + $0x2] sm:$0x3] }
 0x122   :  { %v152_v35 = vsub.f32 %v149_v32, %v151_v34  ;;  %v155_v36 = vsub.f32 %v181_v33, %v151_v34 }
 0x124   :  { %v153_v37 = vmul.f32 1.442695, %v152_v35  ;;  %v156_v38 = vmul.f32 1.442695, %v155_v36 }
 0x126   :  { %191 = vpow2.f32 %v153_v37 }
 0x127   :  { %193 = vpow2.f32 %v156_v38 }
 0x12c   :  { %v192_v39 = vpop.eup %191 }
 0x12d   :  { %v194_v40 = vpop.eup %193 }
 0x12e   :  { %v158_v41 = vadd.f32 %v194_v40, %v192_v39 }
 0x130   :  { %195 = vlog2.f32 %v158_v41 }
 0x136   :  { %v196_v42 = vpop.eup %195 }
 0x137   :  { %v160_v43 = vmul.f32 0.6931472, %v196_v42 }
 0x139   :  { %v161_v45 = vadd.f32 %v160_v43, %v151_v34 }
 0x13b   :  { %v165_v46 = vmul.f32 %v186_v44, %v161_v45 }
 0x13d   :  { %v166_v48 = vsub.f32 %v149_v32, %v165_v46  ;;  %v169_v49 = vsub.f32 %v182_v47, %v165_v46 }
 0x13f   :  { %167 = vst [vmem:[%s328_s6] sm:$0x3] %v166_v48 }
 0x140   :  { %183 = vst [vmem:[%s328_s6 + $0x2] sm:$0x3] %v169_v49 }

</bundles_post_ra>
